<compile_context>
chip_gen: v7x
topology: tpu7x:2x2x1
jax: 0.10.0
libtpu: 0.0.40
codegen_flags: <defaults>
</compile_context>

<pallas_src>
import numpy as np
import jax
import jax.numpy as jnp
from jax.experimental import pallas as pl
from jax.experimental.pallas import tpu as pltpu

H = W = 4
S = H * W          # 4x4 spatial, flattened
LANE = 128


def _round_up(v, m):
    return ((v + m - 1) // m) * m


def generator_kernel(x_ref, w1_ref, b1_ref, w2_ref, b2_ref, w3_ref, b3_ref, o_ref):
    # conv1 (nz -> ngf, k=4, pad=3 on a 1x1 input) as a dense matmul.
    # bf16 operands, f32 accumulation; bias / activation math in f32.
    h = jnp.dot(x_ref[...], w1_ref[...], preferred_element_type=jnp.float32) + b1_ref[...]
    h = jnp.maximum(h, 0.2 * h)                               # LeakyReLU(0.2)

    # conv2 (ngf -> ngf, 3x3, pad=1 on 4x4) unrolled to a (S*ngf, S*ngf) matmul.
    h = jnp.dot(h.astype(w2_ref.dtype), w2_ref[...],
                preferred_element_type=jnp.float32) + b2_ref[...]
    h = jnp.maximum(h, 0.2 * h)                               # LeakyReLU(0.2)

    # to_rgb_block: 1x1 conv (ngf -> nc) as a block matmul whose columns are
    # channel-major (c*S + s) and zero-padded to 128 lanes -> the output block
    # is the NCHW-flattened result, stored lane-dense in bf16. Tanh on EUP.
    h = jnp.dot(h.astype(w3_ref.dtype), w3_ref[...],
                preferred_element_type=jnp.float32) + b3_ref[...]
    o_ref[...] = jnp.tanh(h).astype(o_ref.dtype)


def build_dense_weights(W1, b1, W2, b2, W3, b3):
    """Exactly unroll the three convs (4x4 spatial) into dense matmul weights.

    Returns bf16 matmul weights, f32 biases, and (nc, n_pad) metadata.
    Hidden-column layout is spatial-major (col = s*ngf + c); the to_rgb output
    columns are channel-major (col = c*S + s) so the kernel emits NCHW directly.
    """
    W1, b1 = np.asarray(W1, np.float32), np.asarray(b1, np.float32)
    W2, b2 = np.asarray(W2, np.float32), np.asarray(b2, np.float32)
    W3, b3 = np.asarray(W3, np.float32), np.asarray(b3, np.float32)
    ngf, nz = W1.shape[0], W1.shape[1]
    nc = W3.shape[0]

    # conv1: out[b,co,oh,ow] = sum_ci x[b,ci] * W1[co,ci,3-oh,3-ow] + b1[co]
    W1f = W1[:, :, ::-1, ::-1]                               # [co, ci, oh, ow]
    W1m = np.ascontiguousarray(np.transpose(W1f, (1, 2, 3, 0))).reshape(nz, S * ngf)
    b1m = np.tile(b1, S)[None, :]

    # conv2: 3x3, pad 1 -> banded (S*ngf, S*ngf)
    W2m = np.zeros((S * ngf, S * ngf), np.float32)
    for oh in range(H):
        for ow in range(W):
            for kh in range(3):
                for kw in range(3):
                    ih, iw = oh + kh - 1, ow + kw - 1
                    if 0 <= ih < H and 0 <= iw < W:
                        si, so = ih * W + iw, oh * W + ow
                        W2m[si * ngf:(si + 1) * ngf, so * ngf:(so + 1) * ngf] = W2[:, :, kh, kw].T
    b2m = np.tile(b2, S)[None, :]

    # conv3: 1x1 -> channel-major columns (NCHW-flattened output), zero-padded
    # to a lane-dense (>=128) width so stores are full vst.
    s_nc = S * nc
    n_pad = max(LANE, _round_up(s_nc, LANE))
    W3m = np.zeros((S * ngf, n_pad), np.float32)
    b3m = np.zeros((1, n_pad), np.float32)
    w3_2d = W3[:, :, 0, 0]                                   # (nc, ngf)
    for s in range(S):
        for c in range(nc):
            col = c * S + s                                  # channel-major
            W3m[s * ngf:(s + 1) * ngf, col] = w3_2d[c]
            b3m[0, col] = b3[c]

    dense = (jnp.asarray(W1m, jnp.bfloat16), jnp.asarray(b1m, jnp.float32),
             jnp.asarray(W2m, jnp.bfloat16), jnp.asarray(b2m, jnp.float32),
             jnp.asarray(W3m, jnp.bfloat16), jnp.asarray(b3m, jnp.float32))
    meta = (nc, n_pad)
    return dense, meta


def generator_forward(x, dense_params, meta):
    W1m, b1m, W2m, b2m, W3m, b3m = dense_params
    nc, n_pad = meta
    x = x.reshape(x.shape[0], -1)            # accepts (B, nz) or (B, nz, 1, 1)
    B, nz = x.shape
    s_ngf = W1m.shape[1]
    s_nc = S * nc

    # ---- batch tiling -------------------------------------------------------
    # Cap TB so each f32 intermediate (TB, S*ngf) stays ~<= 4 MiB, max 1024.
    budget_rows = (4 << 20) // (s_ngf * 4)
    cap = max(8, min(1024, (budget_rows // 8) * 8))
    B8 = _round_up(B, 8)
    # >=2 grid steps when there is enough work (keeps both TCs busy on v7x),
    # more steps only when B exceeds the tile cap. Padding waste <= 8*steps rows.
    min_steps = 2 if B8 >= 128 else 1
    steps = max(min_steps, -(-B8 // cap))
    TB = _round_up(-(-B8 // steps), 8)
    B_pad = TB * steps

    # Pad + cast activations (skip the pad when B is already tile-aligned).
    if B_pad == B:
        x_bf16 = x.astype(jnp.bfloat16)
    else:
        x_bf16 = jnp.zeros((B_pad, nz), jnp.bfloat16).at[:B].set(x.astype(jnp.bfloat16))

    out_flat = pl.pallas_call(
        generator_kernel,
        out_shape=jax.ShapeDtypeStruct((B_pad, n_pad), jnp.bfloat16),
        grid=(B_pad // TB,),
        in_specs=[
            pl.BlockSpec((TB, nz), lambda i: (i, 0)),         # activations stream
            pl.BlockSpec(W1m.shape, lambda i: (0, 0)),        # weights stay resident
            pl.BlockSpec(b1m.shape, lambda i: (0, 0)),
            pl.BlockSpec(W2m.shape, lambda i: (0, 0)),
            pl.BlockSpec(b2m.shape, lambda i: (0, 0)),
            pl.BlockSpec(W3m.shape, lambda i: (0, 0)),
            pl.BlockSpec(b3m.shape, lambda i: (0, 0)),
        ],
        out_specs=pl.BlockSpec((TB, n_pad), lambda i: (i, 0)),
        compiler_params=pltpu.CompilerParams(
            dimension_semantics=("parallel",),                # both TCs on v7x
            vmem_limit_bytes=32 << 20),
    )(x_bf16, W1m, b1m, W2m, b2m, W3m, b3m)

    # Output columns are already NCHW-flattened (channel-major): slice the real
    # rows/cols, upcast to f32, reshape -- no transpose pass needed.
    return out_flat[:B, :s_nc].astype(jnp.float32).reshape(B, nc, H, W)


def reference_forward(x, W1, b1, W2, b2, W3, b3):
    """Pure-JAX NCHW reference of the PyTorch forward (for verification)."""
    B = x.shape[0]
    nz = W1.shape[1]
    dn = ('NCHW', 'OIHW', 'NCHW')
    h = x.reshape(B, nz, 1, 1)
    h = jax.lax.conv_general_dilated(h, W1, (1, 1), [(3, 3), (3, 3)],
                                     dimension_numbers=dn) + b1[None, :, None, None]
    h = jnp.where(h >= 0, h, 0.2 * h)
    h = jax.lax.conv_general_dilated(h, W2, (1, 1), [(1, 1), (1, 1)],
                                     dimension_numbers=dn) + b2[None, :, None, None]
    h = jnp.where(h >= 0, h, 0.2 * h)
    h = jax.lax.conv_general_dilated(h, W3, (1, 1), [(0, 0), (0, 0)],
                                     dimension_numbers=dn) + b3[None, :, None, None]
    return jnp.tanh(h)


# TODO(synk): grow_network / flush_network / FadeinLayer are training-time graph
# surgery for progressive growing; only the initial (first_block + to_rgb) forward
# is implemented here.
# TODO(synk): very large ngf (e.g. 512) makes the unrolled conv2 weight (16*ngf)^2;
# that config would need K-tiling of the conv2 matmul instead of a resident block.

if __name__ == "__main__":
    # small config consistent with the module
    B, nz, ngf, nc = 2, 32, 32, 3

    key = jax.random.PRNGKey(0)
    k = jax.random.split(key, 7)
    W1 = 0.1 * jax.random.normal(k[0], (ngf, nz, 4, 4), jnp.float32)
    b1 = 0.1 * jax.random.normal(k[1], (ngf,), jnp.float32)
    W2 = 0.1 * jax.random.normal(k[2], (ngf, ngf, 3, 3), jnp.float32)
    b2 = 0.1 * jax.random.normal(k[3], (ngf,), jnp.float32)
    W3 = 0.1 * jax.random.normal(k[4], (nc, ngf, 1, 1), jnp.float32)
    b3 = 0.1 * jax.random.normal(k[5], (nc,), jnp.float32)
    x = jax.random.normal(k[6], (B, nz), jnp.float32)   # forward views it as (B, nz, 1, 1)

    dense, meta = build_dense_weights(W1, b1, W2, b2, W3, b3)
    out = generator_forward(x, dense, meta)
    out = jax.block_until_ready(out)

    assert out.shape == (B, nc, 4, 4), out.shape

    ref = jax.block_until_ready(reference_forward(x, W1, b1, W2, b2, W3, b3))
    # bf16 matmul operands + bf16 output store -> ~1e-2-level agreement expected.
    np.testing.assert_allclose(np.asarray(out), np.asarray(ref), atol=2e-2, rtol=2e-2)

    print("KERNEL_OK")
</pallas_src>

<mosaic_0001>
module attributes {stable_mosaic.version = 11 : i64} {
  func.func @generator_kernel(%arg0: i32, %arg1: memref<8x32xbf16, #tpu.memory_space<vmem>>, %arg2: memref<32x512xbf16, #tpu.memory_space<vmem>>, %arg3: memref<1x512xf32, #tpu.memory_space<vmem>>, %arg4: memref<512x512xbf16, #tpu.memory_space<vmem>>, %arg5: memref<1x512xf32, #tpu.memory_space<vmem>>, %arg6: memref<512x128xbf16, #tpu.memory_space<vmem>>, %arg7: memref<1x128xf32, #tpu.memory_space<vmem>>, %arg8: memref<8x128xbf16, #tpu.memory_space<vmem>>) attributes {dimension_semantics = [#tpu.dimension_semantics<parallel>], iteration_bounds = array<i64: 1>, scalar_prefetch = 0 : i64, scratch_operands = 0 : i64, tpu.core_type = #tpu.core_type<tc>, window_params = [{transform_indices = @transform_0, window_bounds = array<i64: 8, 32>}, {pipeline_mode = #tpu.pipeline_mode<synchronous>, transform_indices = @transform_1, window_bounds = array<i64: 32, 512>}, {pipeline_mode = #tpu.pipeline_mode<synchronous>, transform_indices = @transform_2, window_bounds = array<i64: 1, 512>}, {pipeline_mode = #tpu.pipeline_mode<synchronous>, transform_indices = @transform_3, window_bounds = array<i64: 512, 512>}, {pipeline_mode = #tpu.pipeline_mode<synchronous>, transform_indices = @transform_4, window_bounds = array<i64: 1, 512>}, {pipeline_mode = #tpu.pipeline_mode<synchronous>, transform_indices = @transform_5, window_bounds = array<i64: 512, 128>}, {pipeline_mode = #tpu.pipeline_mode<synchronous>, transform_indices = @transform_6, window_bounds = array<i64: 1, 128>}, {transform_indices = @transform_7, window_bounds = array<i64: 8, 128>}]} {
    %c0 = arith.constant 0 : index
    %c0_0 = arith.constant 0 : index
    %0 = vector.load %arg1[%c0, %c0_0] : memref<8x32xbf16, #tpu.memory_space<vmem>>, vector<8x32xbf16>
    %c0_1 = arith.constant 0 : index
    %c0_2 = arith.constant 0 : index
    %1 = vector.load %arg2[%c0_1, %c0_2] : memref<32x512xbf16, #tpu.memory_space<vmem>>, vector<32x512xbf16>
    %cst = arith.constant dense<0.000000e+00> : vector<8x512xf32>
    %2 = tpu.matmul %0, %1, %cst {dimension_numbers = #tpu.dot_dimension_numbers<[1], [0], [0], [1], [0, 0, 1, 1], [], []>} : vector<8x32xbf16>, vector<32x512xbf16>, vector<8x512xf32> -> vector<8x512xf32>
    %c0_3 = arith.constant 0 : index
    %c0_4 = arith.constant 0 : index
    %3 = vector.load %arg3[%c0_3, %c0_4] : memref<1x512xf32, #tpu.memory_space<vmem>>, vector<1x512xf32>
    %4 = vector.broadcast %3 : vector<1x512xf32> to vector<8x512xf32>
    %5 = arith.addf %2, %4 : vector<8x512xf32>
    %cst_5 = arith.constant 2.000000e-01 : f32
    %6 = vector.broadcast %cst_5 : f32 to vector<8x512xf32>
    %7 = arith.mulf %6, %5 : vector<8x512xf32>
    %8 = arith.maximumf %5, %7 : vector<8x512xf32>
    %9 = arith.truncf %8 : vector<8x512xf32> to vector<8x512xbf16>
    %c0_6 = arith.constant 0 : index
    %c0_7 = arith.constant 0 : index
    %10 = vector.load %arg4[%c0_6, %c0_7] : memref<512x512xbf16, #tpu.memory_space<vmem>>, vector<512x512xbf16>
    %cst_8 = arith.constant dense<0.000000e+00> : vector<8x512xf32>
    %11 = tpu.matmul %9, %10, %cst_8 {dimension_numbers = #tpu.dot_dimension_numbers<[1], [0], [0], [1], [0, 0, 1, 1], [], []>} : vector<8x512xbf16>, vector<512x512xbf16>, vector<8x512xf32> -> vector<8x512xf32>
    %c0_9 = arith.constant 0 : index
    %c0_10 = arith.constant 0 : index
    %12 = vector.load %arg5[%c0_9, %c0_10] : memref<1x512xf32, #tpu.memory_space<vmem>>, vector<1x512xf32>
    %13 = vector.broadcast %12 : vector<1x512xf32> to vector<8x512xf32>
    %14 = arith.addf %11, %13 : vector<8x512xf32>
    %cst_11 = arith.constant 2.000000e-01 : f32
    %15 = vector.broadcast %cst_11 : f32 to vector<8x512xf32>
    %16 = arith.mulf %15, %14 : vector<8x512xf32>
    %17 = arith.maximumf %14, %16 : vector<8x512xf32>
    %18 = arith.truncf %17 : vector<8x512xf32> to vector<8x512xbf16>
    %c0_12 = arith.constant 0 : index
    %c0_13 = arith.constant 0 : index
    %19 = vector.load %arg6[%c0_12, %c0_13] : memref<512x128xbf16, #tpu.memory_space<vmem>>, vector<512x128xbf16>
    %cst_14 = arith.constant dense<0.000000e+00> : vector<8x128xf32>
    %20 = tpu.matmul %18, %19, %cst_14 {dimension_numbers = #tpu.dot_dimension_numbers<[1], [0], [0], [1], [0, 0, 1, 1], [], []>} : vector<8x512xbf16>, vector<512x128xbf16>, vector<8x128xf32> -> vector<8x128xf32>
    %c0_15 = arith.constant 0 : index
    %c0_16 = arith.constant 0 : index
    %21 = vector.load %arg7[%c0_15, %c0_16] : memref<1x128xf32, #tpu.memory_space<vmem>>, vector<1x128xf32>
    %22 = vector.broadcast %21 : vector<1x128xf32> to vector<8x128xf32>
    %23 = arith.addf %20, %22 : vector<8x128xf32>
    %24 = math.tanh %23 : vector<8x128xf32>
    %25 = arith.truncf %24 : vector<8x128xf32> to vector<8x128xbf16>
    %c0_17 = arith.constant 0 : index
    %c0_18 = arith.constant 0 : index
    %26 = vector.load %arg8[%c0_17, %c0_18] : memref<8x128xbf16, #tpu.memory_space<vmem>>, vector<8x128xbf16>
    tpu.vector_store %arg8[%c0_17, %c0_18], %25 {strides = array<i32>} : memref<8x128xbf16, #tpu.memory_space<vmem>>, vector<8x128xbf16>,
    return
  }
  func.func @transform_0(%arg0: i32) -> (i32, i32) {
    %c0_i32 = arith.constant 0 : i32
    %c0_i32_0 = arith.constant 0 : i32
    return %arg0, %c0_i32 : i32, i32
  }
  func.func @transform_1(%arg0: i32) -> (i32, i32) {
    %c0_i32 = arith.constant 0 : i32
    %c0_i32_0 = arith.constant 0 : i32
    %c0_i32_1 = arith.constant 0 : i32
    return %c0_i32, %c0_i32_0 : i32, i32
  }
  func.func @transform_2(%arg0: i32) -> (i32, i32) {
    %c0_i32 = arith.constant 0 : i32
    %c0_i32_0 = arith.constant 0 : i32
    %c0_i32_1 = arith.constant 0 : i32
    return %c0_i32, %c0_i32_0 : i32, i32
  }
  func.func @transform_3(%arg0: i32) -> (i32, i32) {
    %c0_i32 = arith.constant 0 : i32
    %c0_i32_0 = arith.constant 0 : i32
    %c0_i32_1 = arith.constant 0 : i32
    return %c0_i32, %c0_i32_0 : i32, i32
  }
  func.func @transform_4(%arg0: i32) -> (i32, i32) {
    %c0_i32 = arith.constant 0 : i32
    %c0_i32_0 = arith.constant 0 : i32
    %c0_i32_1 = arith.constant 0 : i32
    return %c0_i32, %c0_i32_0 : i32, i32
  }
  func.func @transform_5(%arg0: i32) -> (i32, i32) {
    %c0_i32 = arith.constant 0 : i32
    %c0_i32_0 = arith.constant 0 : i32
    %c0_i32_1 = arith.constant 0 : i32
    return %c0_i32, %c0_i32_0 : i32, i32
  }
  func.func @transform_6(%arg0: i32) -> (i32, i32) {
    %c0_i32 = arith.constant 0 : i32
    %c0_i32_0 = arith.constant 0 : i32
    %c0_i32_1 = arith.constant 0 : i32
    return %c0_i32, %c0_i32_0 : i32, i32
  }
  func.func @transform_7(%arg0: i32) -> (i32, i32) {
    %c0_i32 = arith.constant 0 : i32
    %c0_i32_0 = arith.constant 0 : i32
    return %arg0, %c0_i32 : i32, i32
  }
}

</mosaic_0001>

<bundles_post_ra>
// kernel: tpu_custom_call.1
= control target key start
LH: loop header
LB: loop body
LE: loop exit
PB: predicated region body
PF: predicated region fallthrough
CT: control target
= control target key end

     0   :  { %12 = vsyncpa [#allocation3], 0  ;;  %s2328_s0 = inlined_call_operand.hbm [shape: bf16[8,32], index: 0, kind: input, shape index: {}]   ;;  %s2329_s1 = inlined_call_operand.hbm [shape: bf16[32,512], index: 1, kind: input, shape index: {}]   ;;  %s2330_s2 = inlined_call_operand.vmem [shape: f32[1,512], index: 2, kind: input, shape index: {}]   ;;  %s2331_s3 = inlined_call_operand.hbm [shape: bf16[512,512], index: 3, kind: input, shape index: {}]   ;;  %s2332_s4 = inlined_call_operand.vmem [shape: f32[1,512], index: 4, kind: input, shape index: {}]   ;;  %s2333_s5 = inlined_call_operand.hbm [shape: bf16[512,128], index: 5, kind: input, shape index: {}]   ;;  %s2334_s6 = inlined_call_operand.vmem [shape: f32[1,128], index: 6, kind: input, shape index: {}]   ;;  %s2335_s7 = inlined_call_operand.hbm [shape: bf16[8,128], index: 7, kind: output, shape index: {}]  }
   0x1   :  { %13 = vsyncpa [#allocation6], 0 }
   0x2   :  { %14 = vsyncpa [#allocation9], 0 }
   0x3   :  { %15 = vsyncpa [#allocation4], 0  ;;  %s2172_s24 = smov [#allocation5]   ;;  %s2054_s28 = scalar_lea.hbm %s2329_s1, 1024 }
   0x4   :  { %s31_s25 = sshll.u32 %s2172_s24, 4  ;;  %p2055_p0 = scmp.ne.s32.totalorder %s2329_s1, %s2054_s28  ;;  %s32_s25 = int_to_ptr.vmem [resolvable:$true] %s31_s25 }
   0x5   :  { %p2058_p1 = scmp.lt.u32.totalorder %s2054_s28, %s2329_s1 }
   0x7   :  { %p2060_p2 = pnand %p2058_p1, %p2055_p0 }
   0x9   :  { %2063 = shalt.err (!%p2060_p2)
}
   0xa   :  { %s2064_s10 = scalar_lea.vmem %s32_s25, 1024  ;;  %p2069_p4 = scmp.lt.s32.totalorder %s32_s25, %s32_s25 }
   0xb   :  { %p2065_p3 = scmp.ne.s32.totalorder %s32_s25, %s2064_s10  ;;  %p2070_p5 = scmp.lt.s32.totalorder %s2064_s10, %s2064_s10 }
   0xd   :  { %p2071_p6 = por %p2070_p5, %p2069_p4 }
   0xf   :  { %p2072_p7 = pnand %p2071_p6, %p2065_p3 }
  0x11   :  { %2075 = shalt.err (!%p2072_p7)
}
  0x12   :  { %s2173_s11 = smov 256   ;;  %s2174_s12 = smov 16  }
  0x13   :  { %37 = dma.hbm_to_vmem [thread:$0]  %s2329_s1, 1024, %s32_s25, [#allocation6], %s2173_s11, %s2173_s11, %s2174_s12  }
  0x14   :  { %s2175_s15 = smov [#allocation2]   ;;  %s2176_s17 = smov [#allocation7]  }
  0x15   :  { %s22_s16 = sshll.u32 %s2175_s15, 4  ;;  %s45_s18 = sshll.u32 %s2176_s17, 4  ;;  %s23_s16 = int_to_ptr.vmem [resolvable:$true] %s22_s16  ;;  %s46_s18 = int_to_ptr.vmem [resolvable:$true] %s45_s18 }
  0x16   :  { %s2076_s21 = scalar_lea.hbm %s2328_s0, 64 }
  0x17   :  { %p2077_p8 = scmp.ne.s32.totalorder %s2328_s0, %s2076_s21  ;;  %p2080_p9 = scmp.lt.u32.totalorder %s2076_s21, %s2328_s0 }
  0x19   :  { %p2082_p10 = pnand %p2080_p9, %p2077_p8 }
  0x1b   :  { %2085 = shalt.err (!%p2082_p10)
}
  0x1c   :  { %s2086_s1 = scalar_lea.vmem %s23_s16, 64  ;;  %p2091_p12 = scmp.lt.s32.totalorder %s23_s16, %s23_s16 }
  0x1d   :  { %p2087_p11 = scmp.ne.s32.totalorder %s23_s16, %s2086_s1  ;;  %p2092_p13 = scmp.lt.s32.totalorder %s2086_s1, %s2086_s1 }
  0x1f   :  { %p2093_p0 = por %p2092_p13, %p2091_p12 }
  0x21   :  { %p2094_p1 = pnand %p2093_p0, %p2087_p11 }
  0x23   :  { %2097 = shalt.err (!%p2094_p1)
}
  0x24   :  { %25 = dma.hbm_to_vmem [thread:$0]  %s2328_s0, 64, %s23_s16, [#allocation3]  }
  0x25   :  { %s2098_s30 = scalar_lea.hbm %s2331_s3, 16384 }
  0x26   :  { %p2099_p2 = scmp.ne.s32.totalorder %s2331_s3, %s2098_s30  ;;  %p2102_p3 = scmp.lt.u32.totalorder %s2098_s30, %s2331_s3 }
  0x28   :  { %p2104_p4 = pnand %p2102_p3, %p2099_p2 }
  0x2a   :  { %2107 = shalt.err (!%p2104_p4)
}
  0x2b   :  { %s2108_s14 = scalar_lea.vmem %s46_s18, 16384  ;;  %p2113_p6 = scmp.lt.s32.totalorder %s46_s18, %s46_s18 }
  0x2c   :  { %p2109_p5 = scmp.ne.s32.totalorder %s46_s18, %s2108_s14  ;;  %p2114_p7 = scmp.lt.s32.totalorder %s2108_s14, %s2108_s14 }
  0x2e   :  { %p2115_p8 = por %p2114_p7, %p2113_p6 }
  0x30   :  { %p2116_p9 = pnand %p2115_p8, %p2109_p5 }
  0x32   :  { %2119 = shalt.err (!%p2116_p9)
}
  0x33   :  { %51 = dma.hbm_to_vmem [thread:$0]  %s2331_s3, 16384, %s46_s18, [#allocation6], %s2173_s11, %s2173_s11, %s2174_s12  }
  0x34   :  { %s2177_s16 = smov [#allocation8]   ;;  %s2120_s21 = scalar_lea.hbm %s2333_s5, 4096 }
  0x35   :  { %s59_s17 = sshll.u32 %s2177_s16, 4  ;;  %p2121_p10 = scmp.ne.s32.totalorder %s2333_s5, %s2120_s21  ;;  %s60_s17 = int_to_ptr.vmem [resolvable:$true] %s59_s17 }
  0x36   :  { %p2124_p11 = scmp.lt.u32.totalorder %s2120_s21, %s2333_s5 }
  0x38   :  { %p2126_p12 = pnand %p2124_p11, %p2121_p10 }
  0x3a   :  { %2129 = shalt.err (!%p2126_p12)
}
  0x3b   :  { %s2130_s1 = scalar_lea.vmem %s60_s17, 4096  ;;  %p2135_p0 = scmp.lt.s32.totalorder %s60_s17, %s60_s17 }
  0x3c   :  { %p2131_p13 = scmp.ne.s32.totalorder %s60_s17, %s2130_s1  ;;  %p2136_p1 = scmp.lt.s32.totalorder %s2130_s1, %s2130_s1 }
  0x3e   :  { %p2137_p2 = por %p2136_p1, %p2135_p0 }
  0x40   :  { %p2138_p3 = pnand %p2137_p2, %p2131_p13 }
  0x42   :  { %2141 = shalt.err (!%p2138_p3)
}
  0x43   :  { %s2178_s3 = smov 64   ;;  %s2179_s11 = smov 4  }
  0x44   :  { %65 = dma.hbm_to_vmem [thread:$0]  %s2333_s5, 4096, %s60_s17, [#allocation9], %s2178_s3, %s2178_s3, %s2179_s11  }
  0x45   :  { %2164 = dma.done.wait [#allocation3], 64  }
  0x46   :  { %2165 = vsyncadd [#allocation3], 4294967232 }
  0x47   :  { %2166 = dma.done.wait [#allocation6], 17408  }
  0x48   :  { %2167 = vsyncadd [#allocation6], 4294949888 }
  0x49   :  { %2168 = dma.done.wait [#allocation9], 4096  }
  0x4a   :  { %2169 = vsyncadd [#allocation9], 4294963200  ;;  %v2180_v0 = vmov 0   ;;  %v1816_v1 = vld [vmem:[#allocation5 + $0x4] ss:$16 sps:$4 sm:$0xff]   ;;  %vm152_vm0 = vcmask 261120  }
  0x4b   :  { %188 = vmatprep.mubr.bf16.mxu0 %v2180_v0  ;;  %229 = vmatprep.mubr.bf16.mxu1 %v2180_v0  ;;  %v1818_v2 = vld [vmem:[#allocation5] ss:$16 sps:$4 sm:$0xff]   ;;  %v1819_v3 = vld [vmem:[#allocation5 + $0x24] ss:$16 sps:$4 sm:$0xff]   ;;  %v1822_v5 = vld [vmem:[#allocation5 + $0xc] ss:$16 sps:$4 sm:$0xff]  }
  0x4c   :  { %156 = vmatprep.subr.bf16.mxu0 %v1816_v1  ;;  %v1821_v4 = vld [vmem:[#allocation5 + $0x20] ss:$16 sps:$4 sm:$0xff]   ;;  %v1824_v6 = vld [vmem:[#allocation5 + $0x8] ss:$16 sps:$4 sm:$0xff]   ;;  %v81_v7 = vld [vmem:[#allocation2] sm:$0xf]  ;;  %197 = vmatprep.subr.bf16.mxu1 %v1822_v5 }
  0x4d   :  { %157 = vmatpush1.bf16.msra.mxu0 %v1818_v2  ;;  %v1825_v8 = vld [vmem:[#allocation5 + $0x2c] ss:$16 sps:$4 sm:$0xff]   ;;  %198 = vmatpush1.bf16.msra.mxu1 %v1824_v6  ;;  %v1827_v9 = vld [vmem:[#allocation5 + $0x28] ss:$16 sps:$4 sm:$0xff]   ;;  %v1830_v10 = vld [vmem:[#allocation7 + $0x4] ss:$16 sps:$4 sm:$0xff]  }
  0x4e   :  { %158 = vmatprep.subr.bf16.mxu0 %v1819_v3  ;;  %199 = vmatprep.subr.bf16.mxu1 %v1825_v8  ;;  %v1828_v11 = vld [vmem:[#allocation7] ss:$16 sps:$4 sm:$0xff]   ;;  %v1833_v12 = vld [vmem:[#allocation7 + $0xc] ss:$16 sps:$4 sm:$0xff]   ;;  %v1836_v13 = vld [vmem:[#allocation7 + $0x24] ss:$16 sps:$4 sm:$0xff]  }
  0x4f   :  { %v1831_v14 = vld [vmem:[#allocation7 + $0x8] ss:$16 sps:$4 sm:$0xff]   ;;  %v1834_v15 = vld [vmem:[#allocation7 + $0x20] ss:$16 sps:$4 sm:$0xff]   ;;  %v1839_v16 = vld [vmem:[#allocation7 + $0x2c] ss:$16 sps:$4 sm:$0xff]  }
  0x50   :  { %v1842_v17 = vld [vmem:[#allocation7 + $0x44] ss:$16 sps:$4 sm:$0xff]   ;;  %v1837_v18 = vld [vmem:[#allocation7 + $0x28] ss:$16 sps:$4 sm:$0xff]   ;;  %v1840_v19 = vld [vmem:[#allocation7 + $0x40] ss:$16 sps:$4 sm:$0xff]  }
  0x51   :  { %159 = vmatpush1.bf16.msra.mxu0 %v1821_v4  ;;  %200 = vmatpush1.bf16.msra.mxu1 %v1827_v9  ;;  %v1845_v20 = vld [vmem:[#allocation7 + $0x4c] ss:$16 sps:$4 sm:$0xff]   ;;  %v1848_v21 = vld [vmem:[#allocation7 + $0x64] ss:$16 sps:$4 sm:$0xff]   ;;  %v1843_v22 = vld [vmem:[#allocation7 + $0x48] ss:$16 sps:$4 sm:$0xff]  }
  0x52   :  { %1040 = vmatprep.subr.bf16.mxu0 %v1830_v10  ;;  %1122 = vmatprep.subr.bf16.mxu1 %v1833_v12  ;;  %v1846_v23 = vld [vmem:[#allocation7 + $0x60] ss:$16 sps:$4 sm:$0xff]   ;;  %v1851_v24 = vld [vmem:[#allocation7 + $0x6c] ss:$16 sps:$4 sm:$0xff]   ;;  %v1854_v25 = vld [vmem:[#allocation7 + $0x84] ss:$16 sps:$4 sm:$0xff]   ;;  %v92_v12 = vlaneseq }
  0x53   :  { %v1849_v26 = vld [vmem:[#allocation7 + $0x68] ss:$16 sps:$4 sm:$0xff]   ;;  %v1852_v27 = vld [vmem:[#allocation7 + $0x80] ss:$16 sps:$4 sm:$0xff]   ;;  %v1857_v28 = vld [vmem:[#allocation7 + $0x8c] ss:$16 sps:$4 sm:$0xff]  }
  0x54   :  { %1587 = vmatmul.mubr.msk.bf16.vlgmr.msra.gmra.mrb[0].mxu0 %vm152_vm0, %v81_v7  ;;  %1588 = vmatmul.mubr.msk.bf16.vlgmr.msra.gmra.mrb[0].mxu1 %vm152_vm0, %v81_v7  ;;  %v1860_v29 = vld [vmem:[#allocation7 + $0xa4] ss:$16 sps:$4 sm:$0xff]   ;;  %v1855_v30 = vld [vmem:[#allocation7 + $0x88] ss:$16 sps:$4 sm:$0xff]   ;;  %v1858_v31 = vld [vmem:[#allocation7 + $0xa0] ss:$16 sps:$4 sm:$0xff]  }
  0x55   :  { %1041 = vmatpush1.bf16.msra.mxu0 %v1828_v11  ;;  %1123 = vmatpush1.bf16.msra.mxu1 %v1831_v14  ;;  %v1863_v32 = vld [vmem:[#allocation7 + $0xac] ss:$16 sps:$4 sm:$0xff]   ;;  %v1866_v33 = vld [vmem:[#allocation7 + $0xc4] ss:$16 sps:$4 sm:$0xff]   ;;  %v1861_v34 = vld [vmem:[#allocation7 + $0xa8] ss:$16 sps:$4 sm:$0xff]  }
  0x56   :  { %1042 = vmatprep.subr.bf16.mxu0 %v1836_v13  ;;  %1124 = vmatprep.subr.bf16.mxu1 %v1839_v16  ;;  %v1864_v35 = vld [vmem:[#allocation7 + $0xc0] ss:$16 sps:$4 sm:$0xff]   ;;  %v1869_v36 = vld [vmem:[#allocation7 + $0xcc] ss:$16 sps:$4 sm:$0xff]   ;;  %v1872_v37 = vld [vmem:[#allocation7 + $0xe4] ss:$16 sps:$4 sm:$0xff]  }
  0x57   :  { %v1867_v38 = vld [vmem:[#allocation7 + $0xc8] ss:$16 sps:$4 sm:$0xff]   ;;  %v1870_v39 = vld [vmem:[#allocation7 + $0xe0] ss:$16 sps:$4 sm:$0xff]   ;;  %v1875_v40 = vld [vmem:[#allocation7 + $0xec] ss:$16 sps:$4 sm:$0xff]  }
  0x58   :  { %v1878_v41 = vld [vmem:[#allocation7 + $0x104] ss:$16 sps:$4 sm:$0xff]   ;;  %v1873_v42 = vld [vmem:[#allocation7 + $0xe8] ss:$16 sps:$4 sm:$0xff]   ;;  %v1876_v43 = vld [vmem:[#allocation7 + $0x100] ss:$16 sps:$4 sm:$0xff]  }
  0x59   :  { %1043 = vmatpush1.bf16.msra.mxu0 %v1834_v15  ;;  %1125 = vmatpush1.bf16.msra.mxu1 %v1837_v18  ;;  %v1881_v44 = vld [vmem:[#allocation7 + $0x10c] ss:$16 sps:$4 sm:$0xff]   ;;  %v1884_v45 = vld [vmem:[#allocation7 + $0x124] ss:$16 sps:$4 sm:$0xff]   ;;  %v1879_v46 = vld [vmem:[#allocation7 + $0x108] ss:$16 sps:$4 sm:$0xff]  }
  0x5a   :  { %1044 = vmatprep.subr.bf16.mxu0 %v1842_v17  ;;  %1126 = vmatprep.subr.bf16.mxu1 %v1845_v20  ;;  %v1882_v47 = vld [vmem:[#allocation7 + $0x120] ss:$16 sps:$4 sm:$0xff]   ;;  %v1887_v48 = vld [vmem:[#allocation7 + $0x12c] ss:$16 sps:$4 sm:$0xff]   ;;  %v1890_v49 = vld [vmem:[#allocation7 + $0x144] ss:$16 sps:$4 sm:$0xff]  }
  0x5b   :  { %v1885_v50 = vld [vmem:[#allocation7 + $0x128] ss:$16 sps:$4 sm:$0xff]   ;;  %v1888_v51 = vld [vmem:[#allocation7 + $0x140] ss:$16 sps:$4 sm:$0xff]   ;;  %v1893_v52 = vld [vmem:[#allocation7 + $0x14c] ss:$16 sps:$4 sm:$0xff]  }
  0x5c   :  { %v1896_v53 = vld [vmem:[#allocation7 + $0x164] ss:$16 sps:$4 sm:$0xff]   ;;  %v1891_v54 = vld [vmem:[#allocation7 + $0x148] ss:$16 sps:$4 sm:$0xff]   ;;  %v1894_v55 = vld [vmem:[#allocation7 + $0x160] ss:$16 sps:$4 sm:$0xff]  }
  0x5d   :  { %1045 = vmatpush1.bf16.msra.mxu0 %v1840_v19  ;;  %1127 = vmatpush1.bf16.msra.mxu1 %v1843_v22  ;;  %v1899_v56 = vld [vmem:[#allocation7 + $0x16c] ss:$16 sps:$4 sm:$0xff]   ;;  %v1902_v57 = vld [vmem:[#allocation7 + $0x184] ss:$16 sps:$4 sm:$0xff]   ;;  %v1897_v58 = vld [vmem:[#allocation7 + $0x168] ss:$16 sps:$4 sm:$0xff]  }
  0x5e   :  { %1046 = vmatprep.subr.bf16.mxu0 %v1848_v21  ;;  %1128 = vmatprep.subr.bf16.mxu1 %v1851_v24  ;;  %v1900_v59 = vld [vmem:[#allocation7 + $0x180] ss:$16 sps:$4 sm:$0xff]   ;;  %v1905_v60 = vld [vmem:[#allocation7 + $0x18c] ss:$16 sps:$4 sm:$0xff]   ;;  %v1908_v61 = vld [vmem:[#allocation7 + $0x1a4] ss:$16 sps:$4 sm:$0xff]  }
  0x5f   :  { %v1903_v62 = vld [vmem:[#allocation7 + $0x188] ss:$16 sps:$4 sm:$0xff]   ;;  %v1906_v63 = vld [vmem:[#allocation7 + $0x1a0] ss:$16 sps:$4 sm:$0xff]   ;;  %v1911_v0 = vld [vmem:[#allocation7 + $0x1ac] ss:$16 sps:$4 sm:$0xff]  }
  0x60   :  { %v1909_v1 = vld [vmem:[#allocation7 + $0x1a8] ss:$16 sps:$4 sm:$0xff]   ;;  %v1914_v2 = vld [vmem:[#allocation7 + $0x1c4] ss:$16 sps:$4 sm:$0xff]   ;;  %v1917_v3 = vld [vmem:[#allocation7 + $0x1cc] ss:$16 sps:$4 sm:$0xff]  }
  0x61   :  { %1047 = vmatpush1.bf16.msra.mxu0 %v1846_v23  ;;  %1129 = vmatpush1.bf16.msra.mxu1 %v1849_v26  ;;  %v1912_v4 = vld [vmem:[#allocation7 + $0x1c0] ss:$16 sps:$4 sm:$0xff]   ;;  %v1915_v5 = vld [vmem:[#allocation7 + $0x1c8] ss:$16 sps:$4 sm:$0xff]   ;;  %v1920_v6 = vld [vmem:[#allocation7 + $0x1e4] ss:$16 sps:$4 sm:$0xff]  }
  0x62   :  { %1048 = vmatprep.subr.bf16.mxu0 %v1854_v25  ;;  %1130 = vmatprep.subr.bf16.mxu1 %v1857_v28  ;;  %v1923_v7 = vld [vmem:[#allocation7 + $0x1ec] ss:$16 sps:$4 sm:$0xff]   ;;  %v1918_v8 = vld [vmem:[#allocation7 + $0x1e0] ss:$16 sps:$4 sm:$0xff]   ;;  %v1921_v9 = vld [vmem:[#allocation7 + $0x1e8] ss:$16 sps:$4 sm:$0xff]  }
  0x63   :  { %v1926_v10 = vld [vmem:[#allocation7 + $0x204] ss:$16 sps:$4 sm:$0xff]   ;;  %v1929_v11 = vld [vmem:[#allocation7 + $0x20c] ss:$16 sps:$4 sm:$0xff]   ;;  %v2276_v13 = vshrl.u32 %v92_v12, 7  ;;  %s2181_s29 = smov [#allocation10]  }
  0x64   :  { %v2282_v15 = vld [vmem:[%s2330_s2] sm:$0xf]  ;;  %s1568_s30 = sshll.u32 %s2181_s29, 4  ;;  %s1569_s30 = int_to_ptr.vmem [resolvable:$true] %s1568_s30 }
  0x65   :  { %1049 = vmatpush1.bf16.msra.mxu0 %v1852_v27  ;;  %1131 = vmatpush1.bf16.msra.mxu1 %v1855_v30  ;;  %v94_v14 = vsub.s32 0, %v2276_v13  ;;  %v98_v16 = vsub.s32 1, %v2276_v13  ;;  %v106_v18 = vsub.s32 3, %v2276_v13  ;;  %v1983_v12 = vld [vmem:[#allocation7 + $0x32c] ss:$16 sps:$4 sm:$0xff]   ;;  %s2142_s8 = scalar_lea.vmem %s1569_s30, 64  ;;  %p2147_p5 = scmp.lt.s32.totalorder %s1569_s30, %s1569_s30 }
  0x66   :  { %1050 = vmatprep.subr.bf16.mxu0 %v1860_v29  ;;  %1132 = vmatprep.subr.bf16.mxu1 %v1863_v32  ;;  %p2143_p4 = scmp.ne.s32.totalorder %s1569_s30, %s2142_s8  ;;  %p2148_p6 = scmp.lt.s32.totalorder %s2142_s8, %s2142_s8 }
  0x67   :  { %v95_v17 = vrot.slane %v2282_v15, %v94_v14  ;;  %v99_v19 = vrot.slane %v2282_v15, %v98_v16  ;;  %v107_v23 = vrot.slane %v2282_v15, %v106_v18 }
  0x68   :  { %p2149_p7 = por %p2148_p6, %p2147_p5 }
  0x69   :  { %1051 = vmatpush1.bf16.msra.mxu0 %v1858_v31  ;;  %1133 = vmatpush1.bf16.msra.mxu1 %v1861_v34 }
  0x6a   :  { %1052 = vmatprep.subr.bf16.mxu0 %v1866_v33  ;;  %1134 = vmatprep.subr.bf16.mxu1 %v1869_v36  ;;  %p2150_p8 = pnand %p2149_p7, %p2143_p4 }
  0x6d   :  { %1053 = vmatpush1.bf16.msra.mxu0 %v1864_v35  ;;  %1135 = vmatpush1.bf16.msra.mxu1 %v1867_v38  ;;  %v1924_v38 = vld [vmem:[#allocation7 + $0x200] ss:$16 sps:$4 sm:$0xff]  }
  0x6e   :  { %1054 = vmatprep.subr.bf16.mxu0 %v1872_v37  ;;  %1136 = vmatprep.subr.bf16.mxu1 %v1875_v40 }
  0x71   :  { %1055 = vmatpush1.bf16.msra.mxu0 %v1870_v39  ;;  %1137 = vmatpush1.bf16.msra.mxu1 %v1873_v42  ;;  %v1927_v39 = vld [vmem:[#allocation7 + $0x208] ss:$16 sps:$4 sm:$0xff]   ;;  %v1935_v42 = vld [vmem:[#allocation7 + $0x22c] ss:$16 sps:$4 sm:$0xff]  }
  0x72   :  { %1056 = vmatprep.subr.bf16.mxu0 %v1878_v41  ;;  %1138 = vmatprep.subr.bf16.mxu1 %v1881_v44  ;;  %v1932_v41 = vld [vmem:[#allocation7 + $0x224] ss:$16 sps:$4 sm:$0xff]  }
  0x75   :  { %1057 = vmatpush1.bf16.msra.mxu0 %v1876_v43  ;;  %1139 = vmatpush1.bf16.msra.mxu1 %v1879_v46  ;;  %v1933_v46 = vld [vmem:[#allocation7 + $0x228] ss:$16 sps:$4 sm:$0xff]  }
  0x76   :  { %1058 = vmatprep.subr.bf16.mxu0 %v1884_v45  ;;  %1140 = vmatprep.subr.bf16.mxu1 %v1887_v48  ;;  %v1930_v45 = vld [vmem:[#allocation7 + $0x220] ss:$16 sps:$4 sm:$0xff]   ;;  %v1941_v48 = vld [vmem:[#allocation7 + $0x24c] ss:$16 sps:$4 sm:$0xff]  }
  0x79   :  { %1059 = vmatpush1.bf16.msra.mxu0 %v1882_v47  ;;  %1141 = vmatpush1.bf16.msra.mxu1 %v1885_v50  ;;  %v1938_v47 = vld [vmem:[#allocation7 + $0x244] ss:$16 sps:$4 sm:$0xff]   ;;  %v1939_v50 = vld [vmem:[#allocation7 + $0x248] ss:$16 sps:$4 sm:$0xff]  }
  0x7a   :  { %1060 = vmatprep.subr.bf16.mxu0 %v1890_v49  ;;  %1142 = vmatprep.subr.bf16.mxu1 %v1893_v52  ;;  %v1936_v49 = vld [vmem:[#allocation7 + $0x240] ss:$16 sps:$4 sm:$0xff]   ;;  %v1947_v52 = vld [vmem:[#allocation7 + $0x26c] ss:$16 sps:$4 sm:$0xff]  }
  0x7d   :  { %1061 = vmatpush1.bf16.msra.mxu0 %v1888_v51  ;;  %1143 = vmatpush1.bf16.msra.mxu1 %v1891_v54  ;;  %v1944_v51 = vld [vmem:[#allocation7 + $0x264] ss:$16 sps:$4 sm:$0xff]   ;;  %v1945_v54 = vld [vmem:[#allocation7 + $0x268] ss:$16 sps:$4 sm:$0xff]  }
  0x7e   :  { %1062 = vmatprep.subr.bf16.mxu0 %v1896_v53  ;;  %1144 = vmatprep.subr.bf16.mxu1 %v1899_v56  ;;  %v1942_v53 = vld [vmem:[#allocation7 + $0x260] ss:$16 sps:$4 sm:$0xff]   ;;  %v1953_v56 = vld [vmem:[#allocation7 + $0x28c] ss:$16 sps:$4 sm:$0xff]  }
  0x81   :  { %1063 = vmatpush1.bf16.msra.mxu0 %v1894_v55  ;;  %1145 = vmatpush1.bf16.msra.mxu1 %v1897_v58  ;;  %v1950_v55 = vld [vmem:[#allocation7 + $0x284] ss:$16 sps:$4 sm:$0xff]   ;;  %v1951_v58 = vld [vmem:[#allocation7 + $0x288] ss:$16 sps:$4 sm:$0xff]  }
  0x82   :  { %1064 = vmatprep.subr.bf16.mxu0 %v1902_v57  ;;  %1146 = vmatprep.subr.bf16.mxu1 %v1905_v60  ;;  %v1948_v57 = vld [vmem:[#allocation7 + $0x280] ss:$16 sps:$4 sm:$0xff]   ;;  %v1959_v60 = vld [vmem:[#allocation7 + $0x2ac] ss:$16 sps:$4 sm:$0xff]  }
  0x85   :  { %1065 = vmatpush1.bf16.msra.mxu0 %v1900_v59  ;;  %1147 = vmatpush1.bf16.msra.mxu1 %v1903_v62  ;;  %v1956_v59 = vld [vmem:[#allocation7 + $0x2a4] ss:$16 sps:$4 sm:$0xff]   ;;  %v1957_v62 = vld [vmem:[#allocation7 + $0x2a8] ss:$16 sps:$4 sm:$0xff]  }
  0x86   :  { %1066 = vmatprep.subr.bf16.mxu0 %v1908_v61  ;;  %1148 = vmatprep.subr.bf16.mxu1 %v1911_v0  ;;  %v1954_v61 = vld [vmem:[#allocation7 + $0x2a0] ss:$16 sps:$4 sm:$0xff]   ;;  %v1965_v0 = vld [vmem:[#allocation7 + $0x2cc] ss:$16 sps:$4 sm:$0xff]  }
  0x89   :  { %1067 = vmatpush1.bf16.msra.mxu0 %v1906_v63  ;;  %1149 = vmatpush1.bf16.msra.mxu1 %v1909_v1  ;;  %v1962_v63 = vld [vmem:[#allocation7 + $0x2c4] ss:$16 sps:$4 sm:$0xff]   ;;  %v1960_v1 = vld [vmem:[#allocation7 + $0x2c0] ss:$16 sps:$4 sm:$0xff]  }
  0x8a   :  { %1068 = vmatprep.subr.bf16.mxu0 %v1914_v2  ;;  %1150 = vmatprep.subr.bf16.mxu1 %v1917_v3  ;;  %v1963_v2 = vld [vmem:[#allocation7 + $0x2c8] ss:$16 sps:$4 sm:$0xff]   ;;  %v1968_v3 = vld [vmem:[#allocation7 + $0x2e4] ss:$16 sps:$4 sm:$0xff]  }
  0x8d   :  { %1069 = vmatpush1.bf16.msra.mxu0 %v1912_v4  ;;  %1151 = vmatpush1.bf16.msra.mxu1 %v1915_v5  ;;  %v1971_v4 = vld [vmem:[#allocation7 + $0x2ec] ss:$16 sps:$4 sm:$0xff]   ;;  %v1966_v5 = vld [vmem:[#allocation7 + $0x2e0] ss:$16 sps:$4 sm:$0xff]  }
  0x8e   :  { %1070 = vmatprep.subr.bf16.mxu0 %v1920_v6  ;;  %1152 = vmatprep.subr.bf16.mxu1 %v1923_v7  ;;  %v1969_v6 = vld [vmem:[#allocation7 + $0x2e8] ss:$16 sps:$4 sm:$0xff]   ;;  %v1974_v7 = vld [vmem:[#allocation7 + $0x304] ss:$16 sps:$4 sm:$0xff]  }
  0x91   :  { %1071 = vmatpush1.bf16.msra.mxu0 %v1918_v8  ;;  %1153 = vmatpush1.bf16.msra.mxu1 %v1921_v9  ;;  %v1977_v8 = vld [vmem:[#allocation7 + $0x30c] ss:$16 sps:$4 sm:$0xff]   ;;  %v1972_v9 = vld [vmem:[#allocation7 + $0x300] ss:$16 sps:$4 sm:$0xff]  }
  0x92   :  { %1081 = vmatprep.subr.bf16.mxu0 %v1926_v10  ;;  %1163 = vmatprep.subr.bf16.mxu1 %v1929_v11  ;;  %v1975_v10 = vld [vmem:[#allocation7 + $0x308] ss:$16 sps:$4 sm:$0xff]   ;;  %v1980_v11 = vld [vmem:[#allocation7 + $0x324] ss:$16 sps:$4 sm:$0xff]  }
 0x127   :  { %v190_v20 = vpop.f32.mrb[0].mxu0  ;;  %v2295_v28 = vpop.f32.mrb[0].mxu1 }
 0x128   :  { %v191_v21 = vadd.f32 %v190_v20, %v95_v17  ;;  %v192_v22 = vpop.f32.mrb[1].mxu0  ;;  %v233_v30 = vpop.f32.mrb[1].mxu1  ;;  %v1978_v17 = vld [vmem:[#allocation7 + $0x320] ss:$16 sps:$4 sm:$0xff]   ;;  %v1986_v20 = vld [vmem:[#allocation7 + $0x344] ss:$16 sps:$4 sm:$0xff]  }
 0x129   :  { %v193_v24 = vadd.f32 %v192_v22, %v99_v19  ;;  %v194_v25 = vpop.f32.mrb[2].mxu0  ;;  %v234_v32 = vadd.f32 %v233_v30, %v107_v23  ;;  %v235_v33 = vpop.f32.mrb[2].mxu1  ;;  %v1981_v19 = vld [vmem:[#allocation7 + $0x328] ss:$16 sps:$4 sm:$0xff]   ;;  %v1984_v22 = vld [vmem:[#allocation7 + $0x340] ss:$16 sps:$4 sm:$0xff]  }
 0x12a   :  { %v238_v26 = vmul.f32 0.2, %v191_v21  ;;  %v195_v27 = vpop.f32.mrb[3].mxu0  ;;  %v236_v35 = vpop.f32.mrb[3].mxu1  ;;  %v1987_v23 = vld [vmem:[#allocation7 + $0x348] ss:$16 sps:$4 sm:$0xff]  }
 0x12b   :  { %v239_v29 = vmul.f32 0.2, %v193_v24  ;;  %v241_v36 = vmul.f32 0.2, %v234_v32  ;;  %v1995_v25 = vld [vmem:[#allocation7 + $0x36c] ss:$16 sps:$4 sm:$0xff]  }
 0x12c   :  { %v242_v31 = vmax.f32 %v191_v21, %v238_v26  ;;  %v1989_v21 = vld [vmem:[#allocation7 + $0x34c] ss:$16 sps:$4 sm:$0xff]   ;;  %v1990_v26 = vld [vmem:[#allocation7 + $0x360] ss:$16 sps:$4 sm:$0xff]   ;;  %v1993_v27 = vld [vmem:[#allocation7 + $0x368] ss:$16 sps:$4 sm:$0xff]  }
 0x12d   :  { %v243_v34 = vmax.f32 %v193_v24, %v239_v29  ;;  %v245_v43 = vmax.f32 %v234_v32, %v241_v36  ;;  %v1992_v24 = vld [vmem:[#allocation7 + $0x364] ss:$16 sps:$4 sm:$0xff]   ;;  %v2001_v30 = vld [vmem:[#allocation7 + $0x38c] ss:$16 sps:$4 sm:$0xff]   ;;  %v1996_v32 = vld [vmem:[#allocation7 + $0x380] ss:$16 sps:$4 sm:$0xff]  }
 0x12e   :  { %v246_v40 = vpack.c.bf16 %v242_v31, %v242_v31  ;;  %v1998_v29 = vld [vmem:[#allocation7 + $0x384] ss:$16 sps:$4 sm:$0xff]   ;;  %v102_v31 = vsub.s32 2, %v2276_v13  ;;  %v1999_v33 = vld [vmem:[#allocation7 + $0x388] ss:$16 sps:$4 sm:$0xff]  }
 0x12f   :  { %v247_v37 = vpack.c.bf16 %v243_v34, %v243_v34  ;;  %v249_v44 = vpack.c.bf16 %v245_v43, %v245_v43  ;;  %v2004_v35 = vld [vmem:[#allocation7 + $0x3a4] ss:$16 sps:$4 sm:$0xff]   ;;  %v2007_v36 = vld [vmem:[#allocation7 + $0x3ac] ss:$16 sps:$4 sm:$0xff]   ;;  %v2011_v43 = vld [vmem:[#allocation7 + $0x3c8] ss:$16 sps:$4 sm:$0xff]  }
 0x130   :  { %v103_v34 = vrot.slane %v2282_v15, %v102_v31  ;;  %v2016_v15 = vld [vmem:[#allocation7 + $0x3e4] ss:$16 sps:$4 sm:$0xff]  }
 0x131   :  { %1072 = vmatprep.mubr.bf16.mxu0 %v247_v37  ;;  %1154 = vmatprep.mubr.bf16.mxu1 %v247_v37  ;;  %v2002_v37 = vld [vmem:[#allocation7 + $0x3a0] ss:$16 sps:$4 sm:$0xff]  }
 0x132   :  { %1073 = vmatmul.mubr.bf16.vlgmr.msra.gmra.mrb[4].mxu0 %v246_v40  ;;  %1155 = vmatmul.mubr.bf16.vlgmr.msra.gmra.mrb[4].mxu1 %v246_v40  ;;  %v2010_v40 = vld [vmem:[#allocation7 + $0x3c4] ss:$16 sps:$4 sm:$0xff]  }
 0x133   :  { %1082 = vmatpush1.bf16.msra.mxu0 %v1924_v38  ;;  %1164 = vmatpush1.bf16.msra.mxu1 %v1927_v39  ;;  %v2005_v38 = vld [vmem:[#allocation7 + $0x3a8] ss:$16 sps:$4 sm:$0xff]   ;;  %v232_v39 = vadd.f32 %v2295_v28, %v103_v34  ;;  %v2020_v28 = vld [vmem:[#allocation8 + $0x40] sm:$0xff]  }
 0x134   :  { %1083 = vmatprep.subr.bf16.mxu0 %v1932_v41  ;;  %1165 = vmatprep.subr.bf16.mxu1 %v1935_v42  ;;  %v2013_v41 = vld [vmem:[#allocation7 + $0x3cc] ss:$16 sps:$4 sm:$0xff]   ;;  %v2008_v42 = vld [vmem:[#allocation7 + $0x3c0] ss:$16 sps:$4 sm:$0xff]  }
 0x135   :  { %1113 = vmatprep.mubr.bf16.mxu0 %v249_v44  ;;  %1195 = vmatprep.mubr.bf16.mxu1 %v249_v44  ;;  %v240_v44 = vmul.f32 0.2, %v232_v39 }
 0x137   :  { %1084 = vmatpush1.bf16.msra.mxu0 %v1930_v45  ;;  %1166 = vmatpush1.bf16.msra.mxu1 %v1933_v46  ;;  %v2019_v45 = vld [vmem:[#allocation7 + $0x3ec] ss:$16 sps:$4 sm:$0xff]   ;;  %v2014_v46 = vld [vmem:[#allocation7 + $0x3e0] ss:$16 sps:$4 sm:$0xff]  }
 0x138   :  { %1085 = vmatprep.subr.bf16.mxu0 %v1938_v47  ;;  %1167 = vmatprep.subr.bf16.mxu1 %v1941_v48  ;;  %v2017_v47 = vld [vmem:[#allocation7 + $0x3e8] ss:$16 sps:$4 sm:$0xff]   ;;  %v244_v48 = vmax.f32 %v232_v39, %v240_v44 }
 0x13b   :  { %1086 = vmatpush1.bf16.msra.mxu0 %v1936_v49  ;;  %1168 = vmatpush1.bf16.msra.mxu1 %v1939_v50  ;;  %v2021_v49 = vld [vmem:[#allocation8 + $0xc0] sm:$0xff]  }
 0x13c   :  { %1087 = vmatprep.subr.bf16.mxu0 %v1944_v51  ;;  %1169 = vmatprep.subr.bf16.mxu1 %v1947_v52  ;;  %v2022_v50 = vld [vmem:[#allocation8] sm:$0xff]   ;;  %v248_v52 = vpack.c.bf16 %v244_v48, %v244_v48 }
 0x13d   :  { %v2023_v51 = vld [vmem:[#allocation8 + $0x80] sm:$0xff]  }
 0x13f   :  { %1088 = vmatpush1.bf16.msra.mxu0 %v1942_v53  ;;  %1170 = vmatpush1.bf16.msra.mxu1 %v1945_v54  ;;  %v2024_v53 = vld [vmem:[#allocation8 + $0x48] sm:$0xff]  }
 0x140   :  { %1089 = vmatprep.subr.bf16.mxu0 %v1950_v55  ;;  %1171 = vmatprep.subr.bf16.mxu1 %v1953_v56  ;;  %v2025_v54 = vld [vmem:[#allocation8 + $0xc8] sm:$0xff]  }
 0x141   :  { %v2026_v55 = vld [vmem:[#allocation8 + $0x8] sm:$0xff]  }
 0x142   :  { %v2027_v56 = vld [vmem:[#allocation8 + $0x88] sm:$0xff]  }
 0x143   :  { %1090 = vmatpush1.bf16.msra.mxu0 %v1948_v57  ;;  %1172 = vmatpush1.bf16.msra.mxu1 %v1951_v58  ;;  %v2028_v57 = vld [vmem:[#allocation8 + $0x50] sm:$0xff]  }
 0x144   :  { %1091 = vmatprep.subr.bf16.mxu0 %v1956_v59  ;;  %1173 = vmatprep.subr.bf16.mxu1 %v1959_v60  ;;  %v2029_v58 = vld [vmem:[#allocation8 + $0xd0] sm:$0xff]  }
 0x145   :  { %v2030_v59 = vld [vmem:[#allocation8 + $0x10] sm:$0xff]  }
 0x146   :  { %v2031_v60 = vld [vmem:[#allocation8 + $0x90] sm:$0xff]  }
 0x147   :  { %1092 = vmatpush1.bf16.msra.mxu0 %v1954_v61  ;;  %1174 = vmatpush1.bf16.msra.mxu1 %v1957_v62  ;;  %v2032_v61 = vld [vmem:[#allocation8 + $0x58] sm:$0xff]  }
 0x148   :  { %1093 = vmatprep.subr.bf16.mxu0 %v1962_v63  ;;  %1175 = vmatprep.subr.bf16.mxu1 %v1965_v0  ;;  %v2033_v62 = vld [vmem:[#allocation8 + $0xd8] sm:$0xff]  }
 0x149   :  { %v2034_v63 = vld [vmem:[#allocation8 + $0x18] sm:$0xff]  }
 0x14a   :  { %v2035_v0 = vld [vmem:[#allocation8 + $0x98] sm:$0xff]  }
 0x14b   :  { %1094 = vmatpush1.bf16.msra.mxu0 %v1960_v1  ;;  %1176 = vmatpush1.bf16.msra.mxu1 %v1963_v2  ;;  %v2036_v1 = vld [vmem:[#allocation8 + $0x60] sm:$0xff]  }
 0x14c   :  { %1095 = vmatprep.subr.bf16.mxu0 %v1968_v3  ;;  %1177 = vmatprep.subr.bf16.mxu1 %v1971_v4  ;;  %v2037_v2 = vld [vmem:[#allocation8 + $0xe0] sm:$0xff]  }
 0x14d   :  { %v2038_v3 = vld [vmem:[#allocation8 + $0x20] sm:$0xff]  }
 0x14e   :  { %v2039_v4 = vld [vmem:[#allocation8 + $0xa0] sm:$0xff]  }
 0x14f   :  { %1096 = vmatpush1.bf16.msra.mxu0 %v1966_v5  ;;  %1178 = vmatpush1.bf16.msra.mxu1 %v1969_v6  ;;  %v2040_v5 = vld [vmem:[#allocation8 + $0x68] sm:$0xff]  }
 0x150   :  { %1097 = vmatprep.subr.bf16.mxu0 %v1974_v7  ;;  %1179 = vmatprep.subr.bf16.mxu1 %v1977_v8  ;;  %v2041_v6 = vld [vmem:[#allocation8 + $0xe8] sm:$0xff]  }
 0x151   :  { %v2042_v7 = vld [vmem:[#allocation8 + $0x28] sm:$0xff]  }
 0x152   :  { %v2043_v8 = vld [vmem:[#allocation8 + $0xa8] sm:$0xff]  }
 0x153   :  { %1098 = vmatpush1.bf16.msra.mxu0 %v1972_v9  ;;  %1180 = vmatpush1.bf16.msra.mxu1 %v1975_v10  ;;  %v2044_v9 = vld [vmem:[#allocation8 + $0x70] sm:$0xff]  }
 0x154   :  { %1099 = vmatprep.subr.bf16.mxu0 %v1980_v11  ;;  %1181 = vmatprep.subr.bf16.mxu1 %v1983_v12  ;;  %v2045_v10 = vld [vmem:[#allocation8 + $0xf0] sm:$0xff]  }
 0x155   :  { %v2046_v11 = vld [vmem:[#allocation8 + $0x30] sm:$0xff]  }
 0x156   :  { %v2047_v12 = vld [vmem:[#allocation8 + $0xb0] sm:$0xff]  }
 0x157   :  { %1100 = vmatpush1.bf16.msra.mxu0 %v1978_v17  ;;  %1182 = vmatpush1.bf16.msra.mxu1 %v1981_v19  ;;  %v2048_v17 = vld [vmem:[#allocation8 + $0x78] sm:$0xff]  }
 0x158   :  { %1101 = vmatprep.subr.bf16.mxu0 %v1986_v20  ;;  %1183 = vmatprep.subr.bf16.mxu1 %v1989_v21  ;;  %v2049_v19 = vld [vmem:[#allocation8 + $0xf8] sm:$0xff]  }
 0x159   :  { %v2050_v20 = vld [vmem:[#allocation8 + $0x38] sm:$0xff]  }
 0x15a   :  { %v2051_v21 = vld [vmem:[#allocation8 + $0xb8] sm:$0xff]  }
 0x15b   :  { %1102 = vmatpush1.bf16.msra.mxu0 %v1984_v22  ;;  %1184 = vmatpush1.bf16.msra.mxu1 %v1987_v23  ;;  %v378_v22 = vld [vmem:[%s2332_s4] sm:$0xf] }
 0x15c   :  { %1103 = vmatprep.subr.bf16.mxu0 %v1992_v24  ;;  %1185 = vmatprep.subr.bf16.mxu1 %v1995_v25  ;;  %v383_v23 = vrot.slane %v378_v22, %v94_v14  ;;  %v391_v24 = vrot.slane %v378_v22, %v102_v31  ;;  %v387_v25 = vrot.slane %v378_v22, %v98_v16 }
 0x15f   :  { %1104 = vmatpush1.bf16.msra.mxu0 %v1990_v26  ;;  %1186 = vmatpush1.bf16.msra.mxu1 %v1993_v27  ;;  %v395_v26 = vrot.slane %v378_v22, %v106_v18 }
 0x160   :  { %1105 = vmatprep.subr.bf16.mxu0 %v1998_v29  ;;  %1187 = vmatprep.subr.bf16.mxu1 %v2001_v30 }
 0x163   :  { %1106 = vmatpush1.bf16.msra.mxu0 %v1996_v32  ;;  %1188 = vmatpush1.bf16.msra.mxu1 %v1999_v33 }
 0x164   :  { %1107 = vmatprep.subr.bf16.mxu0 %v2004_v35  ;;  %1189 = vmatprep.subr.bf16.mxu1 %v2007_v36 }
 0x167   :  { %1108 = vmatpush1.bf16.msra.mxu0 %v2002_v37  ;;  %1190 = vmatpush1.bf16.msra.mxu1 %v2005_v38 }
 0x168   :  { %1109 = vmatprep.subr.bf16.mxu0 %v2010_v40  ;;  %1191 = vmatprep.subr.bf16.mxu1 %v2013_v41 }
 0x16b   :  { %1110 = vmatpush1.bf16.msra.mxu0 %v2008_v42  ;;  %1192 = vmatpush1.bf16.msra.mxu1 %v2011_v43 }
 0x16c   :  { %1111 = vmatprep.subr.bf16.mxu0 %v2016_v15  ;;  %1193 = vmatprep.subr.bf16.mxu1 %v2019_v45 }
 0x16f   :  { %1112 = vmatpush1.bf16.msra.mxu0 %v2014_v46  ;;  %1194 = vmatpush1.bf16.msra.mxu1 %v2017_v47 }
 0x170   :  { %1750 = vmatprep.subr.bf16.mxu0 %v2020_v28  ;;  %1772 = vmatprep.subr.bf16.mxu1 %v2021_v49  ;;  %v1717_v28 = vld [vmem:[%s2334_s6] ss:$0 sm:$0xff] }
 0x172   :  { %1114 = vmatmul.mubr.bf16.vlgmr.msra.gmra.mrb[4].mxu0 %v248_v52  ;;  %1196 = vmatmul.mubr.bf16.vlgmr.msra.gmra.mrb[4].mxu1 %v248_v52 }
 0x173   :  { %1751 = vmatpush3.bf16.msra.mxu0 %v2022_v50  ;;  %1773 = vmatpush3.bf16.msra.mxu1 %v2023_v51 }
 0x174   :  { %1752 = vmatprep.subr.bf16.mxu0 %v2024_v53  ;;  %1774 = vmatprep.subr.bf16.mxu1 %v2025_v54 }
 0x177   :  { %1753 = vmatpush3.bf16.msra.mxu0 %v2026_v55  ;;  %1775 = vmatpush3.bf16.msra.mxu1 %v2027_v56 }
 0x178   :  { %1754 = vmatprep.subr.bf16.mxu0 %v2028_v57  ;;  %1776 = vmatprep.subr.bf16.mxu1 %v2029_v58 }
 0x17b   :  { %1755 = vmatpush3.bf16.msra.mxu0 %v2030_v59  ;;  %1777 = vmatpush3.bf16.msra.mxu1 %v2031_v60 }
 0x17c   :  { %1756 = vmatprep.subr.bf16.mxu0 %v2032_v61  ;;  %1778 = vmatprep.subr.bf16.mxu1 %v2033_v62 }
 0x17f   :  { %1757 = vmatpush3.bf16.msra.mxu0 %v2034_v63  ;;  %1779 = vmatpush3.bf16.msra.mxu1 %v2035_v0 }
 0x180   :  { %1758 = vmatprep.subr.bf16.mxu0 %v2036_v1  ;;  %1780 = vmatprep.subr.bf16.mxu1 %v2037_v2 }
 0x183   :  { %1759 = vmatpush3.bf16.msra.mxu0 %v2038_v3  ;;  %1781 = vmatpush3.bf16.msra.mxu1 %v2039_v4 }
 0x184   :  { %1760 = vmatprep.subr.bf16.mxu0 %v2040_v5  ;;  %1782 = vmatprep.subr.bf16.mxu1 %v2041_v6 }
 0x187   :  { %1761 = vmatpush3.bf16.msra.mxu0 %v2042_v7  ;;  %1783 = vmatpush3.bf16.msra.mxu1 %v2043_v8 }
 0x188   :  { %1762 = vmatprep.subr.bf16.mxu0 %v2044_v9  ;;  %1784 = vmatprep.subr.bf16.mxu1 %v2045_v10 }
 0x18b   :  { %1763 = vmatpush3.bf16.msra.mxu0 %v2046_v11  ;;  %1785 = vmatpush3.bf16.msra.mxu1 %v2047_v12 }
 0x18c   :  { %1764 = vmatprep.subr.bf16.mxu0 %v2048_v17  ;;  %1786 = vmatprep.subr.bf16.mxu1 %v2049_v19 }
 0x18f   :  { %1765 = vmatpush3.bf16.msra.mxu0 %v2050_v20  ;;  %1787 = vmatpush3.bf16.msra.mxu1 %v2051_v21 }
 0x245   :  { %v1115_v27 = vpop.f32.mrb[4].mxu0  ;;  %v1197_v29 = vpop.f32.mrb[4].mxu1 }
 0x246   :  { %v1794_v30 = vadd.f32 %v1115_v27, %v383_v23  ;;  %v1796_v32 = vadd.f32 %v1197_v29, %v391_v24  ;;  %v1117_v33 = vpop.f32.mrb[5].mxu0  ;;  %v1199_v34 = vpop.f32.mrb[5].mxu1 }
 0x247   :  { %v1795_v35 = vadd.f32 %v1117_v33, %v387_v25  ;;  %v1797_v36 = vadd.f32 %v1199_v34, %v395_v26  ;;  %v1119_v37 = vpop.f32.mrb[6].mxu0  ;;  %v1201_v38 = vpop.f32.mrb[6].mxu1 }
 0x248   :  { %v1204_v14 = vmul.f32 0.2, %v1794_v30  ;;  %v1206_v39 = vmul.f32 0.2, %v1796_v32  ;;  %v1120_v40 = vpop.f32.mrb[7].mxu0  ;;  %v1202_v31 = vpop.f32.mrb[7].mxu1 }
 0x249   :  { %v1205_v41 = vmul.f32 0.2, %v1795_v35  ;;  %v1207_v42 = vmul.f32 0.2, %v1797_v36 }
 0x24a   :  { %v1208_v16 = vmax.f32 %v1794_v30, %v1204_v14  ;;  %v1210_v43 = vmax.f32 %v1796_v32, %v1206_v39 }
 0x24b   :  { %v1209_v13 = vmax.f32 %v1795_v35, %v1205_v41  ;;  %v1211_v18 = vmax.f32 %v1797_v36, %v1207_v42 }
 0x24c   :  { %v1212_v45 = vpack.c.bf16 %v1208_v16, %v1208_v16  ;;  %v1214_v46 = vpack.c.bf16 %v1210_v43, %v1210_v43 }
 0x24d   :  { %v1213_v44 = vpack.c.bf16 %v1209_v13, %v1209_v13  ;;  %v1215_v15 = vpack.c.bf16 %v1211_v18, %v1211_v18 }
 0x24f   :  { %1511 = vmatprep.mubr.bf16.mxu0 %v1213_v44  ;;  %1551 = vmatprep.mubr.bf16.mxu1 %v1215_v15 }
 0x250   :  { %1512 = vmatmul.mubr.bf16.vlgmr.msra.gmra.mrb[8].mxu0 %v1212_v45  ;;  %1552 = vmatmul.mubr.bf16.vlgmr.msra.gmra.mrb[8].mxu1 %v1214_v46 }
 0x323   :  { %v1766_v47 = vpop.f32.mrb[8].mxu0  ;;  %v1788_v48 = vpop.f32.mrb[8].mxu1 }
 0x324   :  { %v1767_v49 = vpop.f32.mrb[9].mxu0  ;;  %v1789_v50 = vpop.f32.mrb[9].mxu1 }
 0x325   :  { %v1768_v51 = vadd.f32 %v1767_v49, %v1766_v47  ;;  %v1790_v52 = vadd.f32 %v1789_v50, %v1788_v48  ;;  %v1769_v53 = vpop.f32.mrb[10].mxu0  ;;  %v1791_v54 = vpop.f32.mrb[10].mxu1 }
 0x326   :  { %v1770_v55 = vpop.f32.mrb[11].mxu0  ;;  %v1792_v56 = vpop.f32.mrb[11].mxu1 }
 0x327   :  { %v1514_v57 = vadd.f32 %v1768_v51, %v1717_v28 }
 0x329   :  { %v1554_v58 = vadd.f32 %v1790_v52, %v1514_v57 }
 0x32b   :  { %2052 = vtanh.f32 %v1554_v58 }
 0x335   :  { %v2053_v59 = vpop.eup %2052 }
 0x336   :  { %v1560_v60 = vpack.c.bf16 %v2053_v59, %v2053_v59 }
 0x338   :  { %1561 = vst [vmem:[#allocation10] sm:$0xf] %v1560_v60 }
 0x339   :  { %2153 = shalt.err (!%p2150_p8)
}
 0x33a   :  { %s2154_s10 = scalar_lea.hbm %s2335_s7, 64 }
 0x33b   :  { %p2155_p9 = scmp.ne.s32.totalorder %s2335_s7, %s2154_s10  ;;  %p2158_p10 = scmp.lt.u32.totalorder %s2154_s10, %s2335_s7 }
 0x33d   :  { %p2160_p11 = pnand %p2158_p10, %p2155_p9 }
 0x33f   :  { %2163 = shalt.err (!%p2160_p11)
}
 0x340   :  { %1571 = dma.vmem_to_hbm [thread:$0]  %s1569_s30, 64, %s2335_s7, [#allocation4]  }
 0x341   :  { %2170 = dma.done.wait [#allocation4], 64  }
 0x342   :  { %2171 = vsyncadd [#allocation4], 4294967232 }
 0x343   :  { %1575 = vsyncpa [#allocation3], 1 }
 0x344   :  { %1576 = vsyncpa [#allocation6], 1 }
 0x345   :  { %1577 = vsyncpa [#allocation9], 1 }
 0x346   :  { %1578 = vsyncpa [#allocation4], 1 }

</bundles_post_ra>
